<compile_context>
chip_gen: v7x
topology: tpu7x:2x2x1
jax: 0.10.0
libtpu: 0.0.40
codegen_flags: <defaults>
</compile_context>

<pallas_src>
import jax
import jax.numpy as jnp
from jax.experimental import pallas as pl
from jax.experimental.pallas import tpu as pltpu

# ---- model hyperparameters (small, consistent with the module) -------------
VOCAB_SIZE = 50
EMBED_DIM = 16
NUM_FILTERS = 8
KERNEL_SIZES = (2, 3, 4)
NUM_CLASSES = 4
DROPOUT = 0.5          # eval-mode => identity
SEQ_LEN = 12
BATCH = 2

K_MAX = max(KERNEL_SIZES)                    # 4
S_PAD = ((SEQ_LEN + 7) // 8) * 8             # 16: sublane-aligned rows / batch
PAD_LANES = 128                              # lane-dense N for conv / fc / out
FEAT_DIM = NUM_FILTERS * len(KERNEL_SIZES)   # 24 real feature columns
NEG_FILL = -1e30                             # finite "masked" value (no NaN)

# packed-weights row layout (all offsets multiples of 8 -> aligned slices)
KV = K_MAX * VOCAB_SIZE                      # 200: fused conv tables
FC_OFF = KV                                  # 200..327: fc weight (128 rows)
MASK_OFF = FC_OFF + PAD_LANES                # 328..343: additive mask (S_PAD)
BCONV_OFF = MASK_OFF + S_PAD                 # 344: conv bias row
BFC_OFF = BCONV_OFF + 8                      # 352: fc bias row
ROWS_TOTAL = BFC_OFF + 8                     # 360 rows total

OUT_ROWS = ((BATCH + 7) // 8) * 8            # 8: sublane-dense output rows


# ---- fused Pallas kernel ----------------------------------------------------
def textcnn_kernel(ids_ref, w_ref, out_ref):
    bsp = ids_ref.shape[0]                    # B * S_PAD flattened window rows
    n_b = bsp // S_PAD

    # --- fused gather+conv: one-hot over the offset-encoded ids, one MXU
    #     matmul against the pre-fused (table @ W_conv) slab (K = 200). ------
    ids = ids_ref[...]                                            # (bsp, K_MAX)
    col = jax.lax.broadcasted_iota(jnp.int32, (bsp, KV), 1)
    hit = ids[:, 0:1] == col
    for i in range(1, K_MAX):                 # offsets live in disjoint blocks
        hit = hit | (ids[:, i:i + 1] == col)
    onehot = hit.astype(jnp.float32)                              # (bsp, 200)
    acc = jnp.dot(onehot, w_ref[0:KV, :],
                  preferred_element_type=jnp.float32)             # (bsp, 128)

    # --- masked max-over-time per batch slab (mask is precomputed additive) -
    mask = w_ref[MASK_OFF:MASK_OFF + S_PAD, :]                    # (S_PAD,128)
    pooled = [jnp.max(acc[b * S_PAD:(b + 1) * S_PAD, :] + mask,
                      axis=0, keepdims=True)                      # (1, 128)
              for b in range(n_b)]
    n_pad = out_ref.shape[0] - n_b
    if n_pad:
        pooled.append(jnp.zeros((n_pad, PAD_LANES), jnp.float32))
    pooled = jnp.concatenate(pooled, axis=0)                      # (8, 128)

    # conv bias after the max (commutes), then ReLU; masked/pad columns
    # (-1e30 + 0 bias) clamp to 0 so they contribute nothing to the fc matmul.
    feat = jnp.maximum(pooled + w_ref[BCONV_OFF:BCONV_OFF + 1, :], 0.0)

    # TODO(synk): nn.Dropout is identity in eval mode; training-mode dropout
    # (random mask) is intentionally not applied here.

    # --- classifier: lane-dense (8,128)@(128,128) matmul + fc bias ----------
    logits = jnp.dot(feat, w_ref[FC_OFF:FC_OFF + PAD_LANES, :],
                     preferred_element_type=jnp.float32)
    out_ref[...] = (logits + w_ref[BFC_OFF:BFC_OFF + 1, :]).astype(out_ref.dtype)


# ---- wrapper ---------------------------------------------------------------
@jax.jit
def textcnn_forward(x_tokens, weights):
    B, S = x_tokens.shape
    # pad each row to S_PAD + K_MAX - 1 tokens, build the shifted id matrix
    # (window row t, offset i -> token id at t+i), and encode the offset into
    # the id so a single one-hot over K_MAX*VOCAB columns covers all offsets.
    ids_pad = jnp.pad(x_tokens.astype(jnp.int32),
                      ((0, 0), (0, S_PAD + K_MAX - 1 - S)))
    shifted = jnp.stack([ids_pad[:, i:i + S_PAD] for i in range(K_MAX)],
                        axis=-1)                                  # (B,S_PAD,K)
    enc = shifted + jnp.arange(K_MAX, dtype=jnp.int32) * VOCAB_SIZE
    enc = enc.reshape(B * S_PAD, K_MAX)

    vmem = pl.BlockSpec(memory_space=pltpu.MemorySpace.VMEM)
    out_pad = pl.pallas_call(
        textcnn_kernel,
        out_shape=jax.ShapeDtypeStruct((OUT_ROWS, PAD_LANES), jnp.float32),
        in_specs=[vmem, vmem],
        out_specs=vmem,
    )(enc, weights)
    return out_pad[:B, :NUM_CLASSES]


# ---- parameter packing (PyTorch layout -> single fused kernel operand) -----
def pack_params(p):
    E, F, V = EMBED_DIM, NUM_FILTERS, VOCAB_SIZE
    table = p["embedding"].astype(jnp.float32)                    # (V, E)

    W = jnp.zeros((ROWS_TOTAL, PAD_LANES), jnp.float32)

    # fused per-offset tables: rows i*V:(i+1)*V = table @ W_conv(offset i),
    # columns j*F:(j+1)*F = branch j (zero for offsets a branch does not use).
    for i in range(K_MAX):
        blk = jnp.zeros((E, PAD_LANES), jnp.float32)
        for j, k in enumerate(KERNEL_SIZES):
            if i < k:
                w = p[f"conv{j + 1}_w"][:, 0, i, :]               # (F, E)
                blk = blk.at[:, j * F:(j + 1) * F].set(w.T)
        W = W.at[i * V:(i + 1) * V, :].set(table @ blk)           # (V, 128)

    # fc weight (padded to 128x128)
    W = W.at[FC_OFF:FC_OFF + FEAT_DIM, :NUM_CLASSES].set(p["fc_w"].T)

    # additive window-validity mask (0 valid / -1e30 invalid), static
    mask = jnp.full((S_PAD, PAD_LANES), NEG_FILL, jnp.float32)
    for j, k in enumerate(KERNEL_SIZES):
        mask = mask.at[:SEQ_LEN - k + 1, j * F:(j + 1) * F].set(0.0)
    W = W.at[MASK_OFF:MASK_OFF + S_PAD, :].set(mask)

    # biases (one row each, padded columns stay zero)
    b_conv = jnp.zeros((PAD_LANES,), jnp.float32)
    for j, k in enumerate(KERNEL_SIZES):
        b_conv = b_conv.at[j * F:(j + 1) * F].set(p[f"conv{j + 1}_b"])
    W = W.at[BCONV_OFF, :].set(b_conv)
    W = W.at[BFC_OFF, :NUM_CLASSES].set(p["fc_b"])

    return W                                                      # (360, 128)


# ---- deterministic parameter init (PyTorch layouts) -------------------------
def make_torch_params(key):
    ks = jax.random.split(key, 9)
    p = {"embedding": 0.1 * jax.random.normal(ks[0], (VOCAB_SIZE, EMBED_DIM),
                                              jnp.float32)}
    for idx, k in enumerate(KERNEL_SIZES):
        p[f"conv{idx + 1}_w"] = 0.1 * jax.random.normal(
            ks[1 + 2 * idx], (NUM_FILTERS, 1, k, EMBED_DIM), jnp.float32)
        p[f"conv{idx + 1}_b"] = 0.1 * jax.random.normal(
            ks[2 + 2 * idx], (NUM_FILTERS,), jnp.float32)
    p["fc_w"] = 0.1 * jax.random.normal(ks[7], (NUM_CLASSES, FEAT_DIM),
                                        jnp.float32)
    p["fc_b"] = 0.1 * jax.random.normal(ks[8], (NUM_CLASSES,), jnp.float32)
    return p


# ---- pure-JAX reference (mirrors the PyTorch module) ------------------------
def textcnn_reference(x_tokens, p):
    emb = p["embedding"][x_tokens].astype(jnp.float32)            # (B, S, E)
    B = x_tokens.shape[0]
    pooled = []
    for j, k in enumerate(KERNEL_SIZES):
        w = p[f"conv{j + 1}_w"].reshape(NUM_FILTERS, k * EMBED_DIM)
        b = p[f"conv{j + 1}_b"]
        L = SEQ_LEN - k + 1
        win = jnp.stack([emb[:, t:t + k, :].reshape(B, k * EMBED_DIM)
                         for t in range(L)], axis=1)              # (B, L, k*E)
        conv = jnp.einsum("blm,fm->blf", win, w) + b[None, None, :]
        conv = jnp.maximum(conv, 0.0)
        pooled.append(jnp.max(conv, axis=1))                      # (B, F)
    feat = jnp.concatenate(pooled, axis=-1)                       # (B, 3F)
    return feat @ p["fc_w"].T + p["fc_b"][None, :]


if __name__ == "__main__":
    key = jax.random.PRNGKey(0)
    pkey, xkey = jax.random.split(key)
    torch_params = make_torch_params(pkey)
    weights = pack_params(torch_params)

    x_tokens = jax.random.randint(xkey, (BATCH, SEQ_LEN), 0, VOCAB_SIZE,
                                  dtype=jnp.int32)

    out = textcnn_forward(x_tokens, weights)
    out = jax.block_until_ready(out)

    ref = textcnn_reference(x_tokens, torch_params)
    assert out.shape == (BATCH, NUM_CLASSES)
    assert jnp.allclose(out, ref, atol=1e-4, rtol=1e-4), (out, ref)

    print("KERNEL_OK")
</pallas_src>

<mosaic_0001>
module attributes {stable_mosaic.version = 11 : i64} {
  func.func @textcnn_kernel(%arg0: memref<32x4xi32, #tpu.memory_space<vmem>>, %arg1: memref<360x128xf32, #tpu.memory_space<vmem>>, %arg2: memref<8x128xf32, #tpu.memory_space<vmem>>) attributes {dimension_semantics = [], scalar_prefetch = 0 : i64, scratch_operands = 0 : i64, tpu.core_type = #tpu.core_type<tc>} {
    %c0 = arith.constant 0 : index
    %c0_0 = arith.constant 0 : index
    %0 = vector.load %arg0[%c0, %c0_0] : memref<32x4xi32, #tpu.memory_space<vmem>>, vector<32x4xi32>
    %1 = tpu.iota {dimensions = array<i32: 1>} : vector<32x200xi32>
    %2 = vector.extract_strided_slice %0 {offsets = [0, 0], sizes = [32, 1], strides = [1, 1]} : vector<32x4xi32> to vector<32x1xi32>
    %3 = vector.broadcast %2 : vector<32x1xi32> to vector<32x200xi32>
    %4 = arith.cmpi eq, %3, %1 : vector<32x200xi32>
    %5 = vector.extract_strided_slice %0 {offsets = [0, 1], sizes = [32, 1], strides = [1, 1]} : vector<32x4xi32> to vector<32x1xi32>
    %6 = vector.broadcast %5 : vector<32x1xi32> to vector<32x200xi32>
    %7 = arith.cmpi eq, %6, %1 : vector<32x200xi32>
    %8 = arith.ori %4, %7 : vector<32x200xi1>
    %9 = vector.extract_strided_slice %0 {offsets = [0, 2], sizes = [32, 1], strides = [1, 1]} : vector<32x4xi32> to vector<32x1xi32>
    %10 = vector.broadcast %9 : vector<32x1xi32> to vector<32x200xi32>
    %11 = arith.cmpi eq, %10, %1 : vector<32x200xi32>
    %12 = arith.ori %8, %11 : vector<32x200xi1>
    %13 = vector.extract_strided_slice %0 {offsets = [0, 3], sizes = [32, 1], strides = [1, 1]} : vector<32x4xi32> to vector<32x1xi32>
    %14 = vector.broadcast %13 : vector<32x1xi32> to vector<32x200xi32>
    %15 = arith.cmpi eq, %14, %1 : vector<32x200xi32>
    %16 = arith.ori %12, %15 : vector<32x200xi1>
    %17 = arith.extui %16 : vector<32x200xi1> to vector<32x200xi32>
    %18 = arith.sitofp %17 : vector<32x200xi32> to vector<32x200xf32>
    %c0_1 = arith.constant 0 : index
    %c0_2 = arith.constant 0 : index
    %19 = vector.load %arg1[%c0_1, %c0_2] : memref<360x128xf32, #tpu.memory_space<vmem>>, vector<200x128xf32>
    %cst = arith.constant dense<0.000000e+00> : vector<32x128xf32>
    %20 = tpu.matmul %18, %19, %cst {dimension_numbers = #tpu.dot_dimension_numbers<[1], [0], [0], [1], [0, 0, 1, 1], [], []>} : vector<32x200xf32>, vector<200x128xf32>, vector<32x128xf32> -> vector<32x128xf32>
    %c328 = arith.constant 328 : index
    %c0_3 = arith.constant 0 : index
    %21 = vector.load %arg1[%c328, %c0_3] : memref<360x128xf32, #tpu.memory_space<vmem>>, vector<16x128xf32>
    %22 = vector.extract_strided_slice %20 {offsets = [0, 0], sizes = [16, 128], strides = [1, 1]} : vector<32x128xf32> to vector<16x128xf32>
    %23 = arith.addf %22, %21 : vector<16x128xf32>
    %cst_4 = arith.constant dense<0xFF800000> : vector<128xf32>
    %24 = vector.multi_reduction <maximumf>, %23, %cst_4 [0] : vector<16x128xf32> to vector<128xf32>
    %25 = vector.shape_cast %24 : vector<128xf32> to vector<1x128xf32>
    %26 = vector.extract_strided_slice %20 {offsets = [16, 0], sizes = [16, 128], strides = [1, 1]} : vector<32x128xf32> to vector<16x128xf32>
    %27 = arith.addf %26, %21 : vector<16x128xf32>
    %cst_5 = arith.constant dense<0xFF800000> : vector<128xf32>
    %28 = vector.multi_reduction <maximumf>, %27, %cst_5 [0] : vector<16x128xf32> to vector<128xf32>
    %29 = vector.shape_cast %28 : vector<128xf32> to vector<1x128xf32>
    %cst_6 = arith.constant 0.000000e+00 : f32
    %30 = vector.broadcast %cst_6 : f32 to vector<6x128xf32>
    %31 = tpu.concatenate %25, %29, %30 in 0 : vector<1x128xf32>, vector<1x128xf32>, vector<6x128xf32> -> vector<8x128xf32>
    %c344 = arith.constant 344 : index
    %c0_7 = arith.constant 0 : index
    %32 = vector.load %arg1[%c344, %c0_7] : memref<360x128xf32, #tpu.memory_space<vmem>>, vector<1x128xf32>
    %33 = vector.broadcast %32 : vector<1x128xf32> to vector<8x128xf32>
    %34 = arith.addf %31, %33 : vector<8x128xf32>
    %cst_8 = arith.constant 0.000000e+00 : f32
    %35 = vector.broadcast %cst_8 : f32 to vector<8x128xf32>
    %36 = arith.maximumf %34, %35 : vector<8x128xf32>
    %c200 = arith.constant 200 : index
    %c0_9 = arith.constant 0 : index
    %37 = vector.load %arg1[%c200, %c0_9] : memref<360x128xf32, #tpu.memory_space<vmem>>, vector<128x128xf32>
    %cst_10 = arith.constant dense<0.000000e+00> : vector<8x128xf32>
    %38 = tpu.matmul %36, %37, %cst_10 {dimension_numbers = #tpu.dot_dimension_numbers<[1], [0], [0], [1], [0, 0, 1, 1], [], []>} : vector<8x128xf32>, vector<128x128xf32>, vector<8x128xf32> -> vector<8x128xf32>
    %c352 = arith.constant 352 : index
    %c0_11 = arith.constant 0 : index
    %39 = vector.load %arg1[%c352, %c0_11] : memref<360x128xf32, #tpu.memory_space<vmem>>, vector<1x128xf32>
    %40 = vector.broadcast %39 : vector<1x128xf32> to vector<8x128xf32>
    %41 = arith.addf %38, %40 : vector<8x128xf32>
    %c0_12 = arith.constant 0 : index
    %c0_13 = arith.constant 0 : index
    %42 = vector.load %arg2[%c0_12, %c0_13] : memref<8x128xf32, #tpu.memory_space<vmem>>, vector<8x128xf32>
    tpu.vector_store %arg2[%c0_12, %c0_13], %41 {strides = array<i32>} : memref<8x128xf32, #tpu.memory_space<vmem>>, vector<8x128xf32>,
    return
  }
}

</mosaic_0001>

<bundles_post_ra>
// kernel: textcnn_forward.1
= control target key start
LH: loop header
LB: loop body
LE: loop exit
PB: predicated region body
PF: predicated region fallthrough
CT: control target
= control target key end

     0   :  { %7 = vsyncpa [#allocation3], 0  ;;  %s584_s9 = smov [#allocation2]   ;;  %s717_s0 = inlined_call_operand.vmem [shape: s32[32,4], index: 0, kind: input, shape index: {}]   ;;  %s718_s1 = inlined_call_operand.hbm [shape: f32[360,128], index: 1, kind: input, shape index: {}]   ;;  %s719_s2 = inlined_call_operand.vmem [shape: f32[8,128], index: 2, kind: output, shape index: {}]  }
   0x1   :  { %s15_s10 = sshll.u32 %s584_s9, 4  ;;  %s560_s13 = scalar_lea.hbm %s718_s1, 5760  ;;  %s16_s10 = int_to_ptr.vmem [resolvable:$true] %s15_s10 }
   0x2   :  { %p561_p0 = scmp.ne.s32.totalorder %s718_s1, %s560_s13  ;;  %p564_p1 = scmp.lt.u32.totalorder %s560_s13, %s718_s1 }
   0x4   :  { %p566_p2 = pnand %p564_p1, %p561_p0 }
   0x6   :  { %569 = shalt.err (!%p566_p2)
}
   0x7   :  { %s570_s18 = scalar_lea.vmem %s16_s10, 5760  ;;  %p575_p4 = scmp.lt.s32.totalorder %s16_s10, %s16_s10 }
   0x8   :  { %p571_p3 = scmp.ne.s32.totalorder %s16_s10, %s570_s18  ;;  %p576_p5 = scmp.lt.s32.totalorder %s570_s18, %s570_s18 }
   0xa   :  { %p577_p6 = por %p576_p5, %p575_p4 }
   0xc   :  { %p578_p7 = pnand %p577_p6, %p571_p3 }
   0xe   :  { %581 = shalt.err (!%p578_p7)
}
   0xf   :  { %s585_s19 = smov 128   ;;  %s586_s20 = smov 8  }
  0x10   :  { %21 = dma.hbm_to_vmem [thread:$0]  %s718_s1, 5760, %s16_s10, [#allocation3], %s585_s19, %s585_s19, %s586_s20  }
  0x11   :  { %582 = dma.done.wait [#allocation3], 5760  }
  0x12   :  { %583 = vsyncadd [#allocation3], 4294961536  ;;  %v587_v0 = vmov 2   ;;  %v588_v1 = vmov 0   ;;  %v589_v2 = vmov 0.0|0.0   ;;  %v25_v3 = vld [vmem:[%s717_s0] sm:$0xff]  ;;  %v29_v47 = vlaneseq }
  0x13   :  { %546 = vset.pattern.permute.xlu1 %v587_v0  ;;  %544 = vset.pattern.permute.xlu0 %v588_v1  ;;  %v152_v4 = vld [vmem:[#allocation2] sm:$0xff]  ;;  %v153_v5 = vld [vmem:[#allocation2 + $0x8] sm:$0xff]  ;;  %v154_v7 = vld [vmem:[#allocation2 + $0x10] sm:$0xff]  ;;  %v590_v10 = vmov 3   ;;  %v591_v11 = vmov 1   ;;  %v592_v45 = vmov 0.0  }
  0x14   :  { %473 = vmatprep.subr.bf16.mxu0 %v589_v2  ;;  %509 = vmatprep.subr.bf16.mxu1 %v589_v2  ;;  %v474_v6 = vpack.c.bf16 %v153_v5, %v152_v4  ;;  %v155_v8 = vld [vmem:[#allocation2 + $0x18] sm:$0xff]  ;;  %v156_v12 = vld [vmem:[#allocation2 + $0x20] sm:$0xff]  ;;  %v157_v13 = vld [vmem:[#allocation2 + $0x28] sm:$0xff]  ;;  %v661_v48 = vand.u32 127, %v29_v47  ;;  %vm720_vm11 = vcmask 588800   ;;  %v593_v58 = vmov 1.0  }
  0x15   :  { %81 = vperm.xlu1 %546, %v25_v3   ;;  %33 = vperm.xlu0 %544, %v25_v3   ;;  %v477_v9 = vpack.c.bf16 %v155_v8, %v154_v7  ;;  %v26_v14 = vld [vmem:[%s717_s0 + $0x8] sm:$0xff]  ;;  %v480_v15 = vpack.c.bf16 %v157_v13, %v156_v12  ;;  %v158_v16 = vld [vmem:[#allocation2 + $0x30] sm:$0xff]  ;;  %v159_v17 = vld [vmem:[#allocation2 + $0x38] sm:$0xff] }
  0x16   :  { %475 = vmatpush1.bf16.msra.mxu0 %v474_v6  ;;  %v483_v18 = vpack.c.bf16 %v159_v17, %v158_v16  ;;  %v160_v19 = vld [vmem:[#allocation2 + $0x40] sm:$0xff]  ;;  %v161_v20 = vld [vmem:[#allocation2 + $0x48] sm:$0xff]  ;;  %v27_v22 = vld [vmem:[%s717_s0 + $0x10] sm:$0xff]  ;;  %v664_v51 = vadd.s32 128, %v661_v48 }
  0x17   :  { %476 = vmatprep.subr.bf16.mxu0 %v589_v2  ;;  %v486_v21 = vpack.c.bf16 %v161_v20, %v160_v19  ;;  %v162_v23 = vld [vmem:[#allocation2 + $0x50] sm:$0xff]  ;;  %v163_v24 = vld [vmem:[#allocation2 + $0x58] sm:$0xff]  ;;  %v164_v27 = vld [vmem:[#allocation2 + $0x60] sm:$0xff] }
  0x18   :  { %v28_v25 = vld [vmem:[%s717_s0 + $0x18] sm:$0xff]  ;;  %v489_v26 = vpack.c.bf16 %v163_v24, %v162_v23  ;;  %v165_v28 = vld [vmem:[#allocation2 + $0x68] sm:$0xff]  ;;  %v166_v30 = vld [vmem:[#allocation2 + $0x70] sm:$0xff] }
  0x19   :  { %547 = vset.pattern.permute.xlu1 %v590_v10  ;;  %545 = vset.pattern.permute.xlu0 %v591_v11  ;;  %v492_v29 = vpack.c.bf16 %v165_v28, %v164_v27  ;;  %v167_v31 = vld [vmem:[#allocation2 + $0x78] sm:$0xff]  ;;  %v168_v33 = vld [vmem:[#allocation2 + $0x80] sm:$0xff]  ;;  %v169_v34 = vld [vmem:[#allocation2 + $0x88] sm:$0xff] }
  0x1a   :  { %109 = vperm.xlu1 %547, %v25_v3   ;;  %53 = vperm.xlu0 %545, %v25_v3   ;;  %v495_v32 = vpack.c.bf16 %v167_v31, %v166_v30  ;;  %v498_v35 = vpack.c.bf16 %v169_v34, %v168_v33  ;;  %v170_v36 = vld [vmem:[#allocation2 + $0x90] sm:$0xff]  ;;  %v171_v37 = vld [vmem:[#allocation2 + $0x98] sm:$0xff]  ;;  %v172_v39 = vld [vmem:[#allocation2 + $0xa0] sm:$0xff] }
  0x1b   :  { %478 = vmatpush1.bf16.msra.mxu0 %v477_v9  ;;  %v501_v38 = vpack.c.bf16 %v171_v37, %v170_v36  ;;  %v173_v40 = vld [vmem:[#allocation2 + $0xa8] sm:$0xff]  ;;  %v174_v42 = vld [vmem:[#allocation2 + $0xb0] sm:$0xff]  ;;  %v175_v43 = vld [vmem:[#allocation2 + $0xb8] sm:$0xff] }
  0x1c   :  { %479 = vmatprep.subr.bf16.mxu0 %v589_v2  ;;  %v504_v41 = vpack.c.bf16 %v173_v40, %v172_v39  ;;  %v507_v44 = vpack.c.bf16 %v175_v43, %v174_v42  ;;  %v176_v46 = vld [vmem:[#allocation2 + $0xc0] sm:$0xff]  ;;  %v306_v8 = vld [vmem:[#allocation2 + $0xc8] sm:$0xff]  ;;  %v307_v9 = vld [vmem:[#allocation2 + $0xd0] sm:$0xff] }
  0x1d   :  { %v309_v12 = vld [vmem:[#allocation2 + $0xe0] sm:$0xff]  ;;  %v312_v17 = vld [vmem:[#allocation2 + $0xf8] sm:$0xff]  ;;  %v314_v20 = vld [vmem:[#allocation2 + $0x108] sm:$0xff] }
  0x1e   :  { %548 = vset.pattern.permute.xlu1 %v588_v1  ;;  %56 = vperm.xlu0 %545, %v26_v14   ;;  %v316_v23 = vld [vmem:[#allocation2 + $0x118] sm:$0xff]  ;;  %v317_v24 = vld [vmem:[#allocation2 + $0x120] sm:$0xff]  ;;  %v319_v27 = vld [vmem:[#allocation2 + $0x130] sm:$0xff] }
  0x1f   :  { %36 = vperm.xlu1 %548, %v26_v14   ;;  %481 = vmatpush1.bf16.msra.mxu0 %v480_v15  ;;  %v311_v15 = vld [vmem:[#allocation2 + $0xf0] sm:$0xff]  ;;  %v321_v30 = vld [vmem:[#allocation2 + $0x140] sm:$0xff]  ;;  %v275_v34 = vld [vmem:[#allocation2 + $0x148] sm:$0xff] }
  0x20   :  { %482 = vmatprep.subr.bf16.mxu0 %v589_v2 }
  0x22   :  { %550 = vset.pattern.permute.xlu0 %v590_v10 }
  0x23   :  { %549 = vset.pattern.permute.xlu1 %v587_v0  ;;  %112 = vperm.xlu0 %550, %v26_v14  }
  0x24   :  { %84 = vperm.xlu1 %549, %v26_v14   ;;  %484 = vmatpush1.bf16.msra.mxu0 %v483_v18  ;;  %v310_v14 = vld [vmem:[#allocation2 + $0xe8] sm:$0xff]  ;;  %v313_v18 = vld [vmem:[#allocation2 + $0x100] sm:$0xff] }
  0x25   :  { %485 = vmatprep.subr.bf16.mxu0 %v589_v2  ;;  %v516_v16 = vpack.c.bf16 %v311_v15, %v310_v14  ;;  %v519_v19 = vpack.c.bf16 %v313_v18, %v312_v17 }
  0x27   :  { %553 = vset.pattern.permute.xlu0 %v587_v0 }
  0x28   :  { %551 = vset.pattern.permute.xlu1 %v588_v1  ;;  %87 = vperm.xlu0 %553, %v27_v22  }
  0x29   :  { %39 = vperm.xlu1 %551, %v27_v22   ;;  %487 = vmatpush1.bf16.msra.mxu0 %v486_v21  ;;  %v315_v21 = vld [vmem:[#allocation2 + $0x110] sm:$0xff] }
  0x2a   :  { %488 = vmatprep.subr.bf16.mxu0 %v589_v2 }
  0x2c   :  { %556 = vset.pattern.permute.xlu0 %v591_v11 }
  0x2d   :  { %552 = vset.pattern.permute.xlu1 %v591_v11  ;;  %62 = vperm.xlu0 %556, %v28_v25   ;;  %v510_v11 = vpack.c.bf16 %v307_v9, %v306_v8 }
  0x2e   :  { %59 = vperm.xlu1 %552, %v27_v22   ;;  %490 = vmatpush1.bf16.msra.mxu0 %v489_v26  ;;  %v318_v26 = vld [vmem:[#allocation2 + $0x128] sm:$0xff] }
  0x2f   :  { %491 = vmatprep.subr.bf16.mxu0 %v589_v2  ;;  %511 = vmatpush3.bf16.msra.mxu1 %v510_v11  ;;  %v528_v28 = vpack.c.bf16 %v319_v27, %v318_v26 }
  0x30   :  { %512 = vmatprep.subr.bf16.mxu1 %v589_v2 }
  0x31   :  { %559 = vset.pattern.permute.xlu0 %v590_v10 }
  0x32   :  { %554 = vset.pattern.permute.xlu1 %v590_v10  ;;  %493 = vmatpush1.bf16.msra.mxu0 %v492_v29  ;;  %v320_v29 = vld [vmem:[#allocation2 + $0x138] sm:$0xff] }
  0x33   :  { %115 = vperm.xlu1 %554, %v27_v22   ;;  %494 = vmatprep.subr.bf16.mxu0 %v589_v2  ;;  %v522_v22 = vpack.c.bf16 %v315_v21, %v314_v20  ;;  %v531_v31 = vpack.c.bf16 %v321_v30, %v320_v29 }
  0x36   :  { %496 = vmatpush1.bf16.msra.mxu0 %v495_v32 }
  0x37   :  { %555 = vset.pattern.permute.xlu1 %v588_v1  ;;  %497 = vmatprep.subr.bf16.mxu0 %v589_v2 }
  0x38   :  { %42 = vperm.xlu1 %555, %v28_v25  }
  0x3a   :  { %499 = vmatpush1.bf16.msra.mxu0 %v498_v35  ;;  %v276_v35 = vld [vmem:[#allocation2 + $0x150] sm:$0xff] }
  0x3b   :  { %500 = vmatprep.subr.bf16.mxu0 %v589_v2 }
  0x3c   :  { %557 = vset.pattern.permute.xlu1 %v587_v0 }
  0x3d   :  { %90 = vperm.xlu1 %557, %v28_v25  }
  0x3e   :  { %502 = vmatpush1.bf16.msra.mxu0 %v501_v38 }
  0x3f   :  { %503 = vmatprep.subr.bf16.mxu0 %v589_v2 }
  0x41   :  { %558 = vset.pattern.permute.xlu1 %v590_v10  ;;  %v308_v10 = vld [vmem:[#allocation2 + $0xd8] sm:$0xff] }
  0x42   :  { %118 = vperm.xlu1 %558, %v28_v25   ;;  %505 = vmatpush1.bf16.msra.mxu0 %v504_v41  ;;  %v513_v13 = vpack.c.bf16 %v309_v12, %v308_v10  ;;  %v525_v25 = vpack.c.bf16 %v317_v24, %v316_v23 }
  0x43   :  { %506 = vmatprep.subr.bf16.mxu0 %v589_v2 }
  0x44   :  { %514 = vmatpush3.bf16.msra.mxu1 %v513_v13 }
  0x45   :  { %515 = vmatprep.subr.bf16.mxu1 %v589_v2 }
  0x46   :  { %508 = vmatpush1.bf16.msra.mxu0 %v507_v44 }
  0x47   :  { %238 = vmatprep.subr.mxu0 %v592_v45 }
  0x48   :  { %517 = vmatpush3.bf16.msra.mxu1 %v516_v16 }
  0x49   :  { %518 = vmatprep.subr.bf16.mxu1 %v589_v2 }
  0x4a   :  { %239 = vmatpush1.msra.mxu0 %v176_v46 }
  0x4c   :  { %520 = vmatpush3.bf16.msra.mxu1 %v519_v19 }
  0x4d   :  { %521 = vmatprep.subr.bf16.mxu1 %v589_v2 }
  0x50   :  { %523 = vmatpush3.bf16.msra.mxu1 %v522_v22 }
  0x51   :  { %524 = vmatprep.subr.bf16.mxu1 %v589_v2 }
  0x54   :  { %526 = vmatpush3.bf16.msra.mxu1 %v525_v25 }
  0x55   :  { %527 = vmatprep.subr.bf16.mxu1 %v589_v2 }
  0x58   :  { %529 = vmatpush3.bf16.msra.mxu1 %v528_v28 }
  0x59   :  { %530 = vmatprep.subr.bf16.mxu1 %v589_v2 }
  0x5c   :  { %532 = vmatpush3.bf16.msra.mxu1 %v531_v31 }
  0x94   :  { %v82_v49 = vpop.permute.xlu1 %81  ;;  %v34_v50 = vpop.permute.xlu0 %33 }
  0x95   :  { %vm44_vm0 = vcmp.eq.s32.totalorder %v34_v50, %v661_v48  ;;  %vm45_vm1 = vcmp.eq.s32.totalorder %v34_v50, %v664_v51  ;;  %vm92_vm5 = vcmp.eq.s32.totalorder %v82_v49, %v661_v48  ;;  %vm93_vm7 = vcmp.eq.s32.totalorder %v82_v49, %v664_v51 }
  0x99   :  { %v110_v52 = vpop.permute.xlu1 %109  ;;  %v54_v53 = vpop.permute.xlu0 %53 }
  0x9a   :  { %vm64_vm2 = vcmp.eq.s32.totalorder %v54_v53, %v661_v48  ;;  %vm65_vm3 = vcmp.eq.s32.totalorder %v54_v53, %v664_v51  ;;  %vm121_vm9 = vcmp.eq.s32.totalorder %v110_v52, %v664_v51  ;;  %vm120_vm13 = vcmp.eq.s32.totalorder %v110_v52, %v661_v48 }
  0x9b   :  { %vm72_vm4 = vmor %vm44_vm0, %vm64_vm2 }
  0x9c   :  { %vm73_vm6 = vmor %vm45_vm1, %vm65_vm3 }
  0x9d   :  { %vm100_vm8 = vmor %vm72_vm4, %vm92_vm5  ;;  %v57_v55 = vpop.permute.xlu0 %56 }
  0x9e   :  { %v37_v54 = vpop.permute.xlu1 %36  ;;  %vm101_vm10 = vmor %vm73_vm6, %vm93_vm7  ;;  %vm66_vm15 = vcmp.eq.s32.totalorder %v57_v55, %v661_v48  ;;  %vm67_vm1 = vcmp.eq.s32.totalorder %v57_v55, %v664_v51 }
  0x9f   :  { %vm129_vm12 = vmor %vm101_vm10, %vm121_vm9  ;;  %vm46_vm14 = vcmp.eq.s32.totalorder %v37_v54, %v661_v48  ;;  %vm47_vm0 = vcmp.eq.s32.totalorder %v37_v54, %v664_v51 }
  0xa0   :  { %v404_v56 = vsel %vm129_vm12, 1.0, %v592_v45  ;;  %vm128_vm2 = vmor %vm100_vm8, %vm120_vm13  ;;  %vm721_vm13 = vcmask 588800  }
  0xa1   :  { %411 = vmatprep.mubr.msk.f32.mxu0 %vm720_vm11, %v404_v56  ;;  %vm74_vm3 = vmor %vm46_vm14, %vm66_vm15 }
  0xa2   :  { %v113_v57 = vpop.permute.xlu0 %112  ;;  %412 = vmatmul.mubr.msk.f32.vlgmr.msra.gmra.mrb[0].mxu0 %vm128_vm2, %v593_v58  ;;  %vm75_vm6 = vmor %vm47_vm0, %vm67_vm1 }
  0xa3   :  { %v85_v59 = vpop.permute.xlu1 %84  ;;  %vm123_vm7 = vcmp.eq.s32.totalorder %v113_v57, %v664_v51  ;;  %vm122_vm12 = vcmp.eq.s32.totalorder %v113_v57, %v661_v48 }
  0xa4   :  { %vm94_vm4 = vcmp.eq.s32.totalorder %v85_v59, %v661_v48  ;;  %vm95_vm5 = vcmp.eq.s32.totalorder %v85_v59, %v664_v51  ;;  %v419_v59 = vld [vmem:[#allocation2 + $0x158] ss:$0 sm:$0xff] }
  0xa5   :  { %vm103_vm9 = vmor %vm75_vm6, %vm95_vm5 }
  0xa6   :  { %vm102_vm10 = vmor %vm74_vm3, %vm94_vm4 }
  0xa7   :  { %vm131_vm11 = vmor %vm103_vm9, %vm123_vm7  ;;  %v88_v63 = vpop.permute.xlu0 %87 }
  0xa8   :  { %v40_v60 = vpop.permute.xlu1 %39  ;;  %v406_v61 = vsel %vm131_vm11, 1.0, %v592_v45  ;;  %vm130_vm8 = vmor %vm102_vm10, %vm122_vm12  ;;  %vm97_vm2 = vcmp.eq.s32.totalorder %v88_v63, %v664_v51  ;;  %vm96_vm11 = vcmp.eq.s32.totalorder %v88_v63, %v661_v48 }
  0xa9   :  { %413 = vmatprep.mubr.msk.f32.mxu0 %vm721_vm13, %v406_v61  ;;  %vm49_vm15 = vcmp.eq.s32.totalorder %v40_v60, %v664_v51  ;;  %vm48_vm3 = vcmp.eq.s32.totalorder %v40_v60, %v661_v48 }
  0xaa   :  { %414 = vmatmul.mubr.msk.f32.gmra.mrb[2].mxu0 %vm130_vm8, %v593_v58  ;;  %vm722_vm8 = vmmov %vm721_vm13 }
  0xac   :  { %v63_v4 = vpop.permute.xlu0 %62 }
  0xad   :  { %v60_v62 = vpop.permute.xlu1 %59 }
  0xae   :  { %vm69_vm14 = vcmp.eq.s32.totalorder %v60_v62, %v664_v51  ;;  %vm68_vm0 = vcmp.eq.s32.totalorder %v60_v62, %v661_v48 }
  0xaf   :  { %vm77_vm1 = vmor %vm49_vm15, %vm69_vm14  ;;  %vm70_vm14 = vcmp.eq.s32.totalorder %v63_v4, %v661_v48 }
  0xb0   :  { %vm76_vm4 = vmor %vm48_vm3, %vm68_vm0  ;;  %vm71_vm0 = vcmp.eq.s32.totalorder %v63_v4, %v664_v51 }
  0xb1   :  { %vm105_vm6 = vmor %vm77_vm1, %vm97_vm2 }
  0xb2   :  { %v116_v0 = vpop.permute.xlu1 %115  ;;  %vm104_vm10 = vmor %vm76_vm4, %vm96_vm11 }
  0xb3   :  { %vm125_vm5 = vcmp.eq.s32.totalorder %v116_v0, %v664_v51  ;;  %vm124_vm7 = vcmp.eq.s32.totalorder %v116_v0, %v661_v48  ;;  %v420_v0 = vld [vmem:[#allocation2 + $0x160] ss:$0 sm:$0xff] }
  0xb4   :  { %vm133_vm9 = vmor %vm105_vm6, %vm125_vm5 }
  0xb5   :  { %v408_v1 = vsel %vm133_vm9, 1.0, %v592_v45  ;;  %vm132_vm12 = vmor %vm104_vm10, %vm124_vm7 }
  0xb6   :  { %415 = vmatprep.mubr.msk.f32.mxu0 %vm722_vm8, %v408_v1 }
  0xb7   :  { %v43_v3 = vpop.permute.xlu1 %42  ;;  %416 = vmatmul.mubr.msk.f32.gmra.mrb[4].mxu0 %vm132_vm12, %v593_v58  ;;  %vm723_vm12 = vmmov %vm722_vm8  ;;  %vm594_vm8 = vmmov 0  }
  0xb8   :  { %vm50_vm13 = vcmp.eq.s32.totalorder %v43_v3, %v661_v48  ;;  %vm51_vm15 = vcmp.eq.s32.totalorder %v43_v3, %v664_v51  ;;  %470 = vmatprep.mubr.msk.f32.mxu1 %vm594_vm8, %v592_v45 }
  0xb9   :  { %vm78_vm2 = vmor %vm50_vm13, %vm70_vm14  ;;  %vm295_vm13 = vcmask 1040384   ;;  %vm297_vm14 = vcmask 1041408  }
  0xba   :  { %vm79_vm3 = vmor %vm51_vm15, %vm71_vm0 }
  0xbc   :  { %v91_v5 = vpop.permute.xlu1 %90 }
  0xbd   :  { %vm99_vm1 = vcmp.eq.s32.totalorder %v91_v5, %v664_v51  ;;  %vm98_vm4 = vcmp.eq.s32.totalorder %v91_v5, %v661_v48 }
  0xbe   :  { %vm107_vm5 = vmor %vm79_vm3, %vm99_vm1 }
  0xbf   :  { %vm106_vm9 = vmor %vm78_vm2, %vm98_vm4 }
  0xc1   :  { %v119_v6 = vpop.permute.xlu1 %118 }
  0xc2   :  { %vm127_vm11 = vcmp.eq.s32.totalorder %v119_v6, %v664_v51  ;;  %vm126_vm6 = vcmp.eq.s32.totalorder %v119_v6, %v661_v48 }
  0xc3   :  { %vm135_vm7 = vmor %vm107_vm5, %vm127_vm11 }
  0xc4   :  { %v410_v7 = vsel %vm135_vm7, 1.0, %v592_v45  ;;  %vm134_vm10 = vmor %vm106_vm9, %vm126_vm6 }
  0xc5   :  { %417 = vmatprep.mubr.msk.f32.mxu0 %vm723_vm12, %v410_v7 }
  0xc6   :  { %418 = vmatmul.mubr.msk.f32.gmra.mrb[6].mxu0 %vm134_vm10, %v593_v58 }
 0x175   :  { %v256_v32 = vpop.f32.mrb[0].mxu0 }
 0x176   :  { %v258_v33 = vpop.f32.mrb[1].mxu0  ;;  %v277_v37 = vadd.f32 %v275_v34, %v256_v32 }
 0x17d   :  { %v261_v36 = vpop.f32.mrb[2].mxu0 }
 0x17e   :  { %v278_v38 = vadd.f32 %v276_v35, %v261_v36  ;;  %v263_v39 = vpop.f32.mrb[3].mxu0 }
 0x180   :  { %v279_v40 = vmax.f32 %v277_v37, %v278_v38 }
 0x182   :  { %v280_v43 = vrot.slane %v279_v40, 4 }
 0x184   :  { %v281_v44 = vmax.f32 %v279_v40, %v280_v43 }
 0x186   :  { %v282_v49 = vrot.slane %v281_v44, 2 }
 0x188   :  { %v283_v51 = vmax.f32 %v281_v44, %v282_v49 }
 0x18a   :  { %v266_v41 = vpop.f32.mrb[4].mxu0  ;;  %v284_v54 = vrot.slane %v283_v51, 1 }
 0x18b   :  { %v268_v42 = vpop.f32.mrb[5].mxu0  ;;  %v286_v46 = vadd.f32 %v275_v34, %v266_v41 }
 0x18c   :  { %v285_v57 = vmax.f32 %v283_v51, %v284_v54 }
 0x199   :  { %v271_v45 = vpop.f32.mrb[6].mxu0 }
 0x19a   :  { %v287_v47 = vadd.f32 %v276_v35, %v271_v45  ;;  %v273_v48 = vpop.f32.mrb[7].mxu0 }
 0x19c   :  { %v288_v2 = vmax.f32 %v286_v46, %v287_v47 }
 0x19e   :  { %v289_v50 = vrot.slane %v288_v2, 4 }
 0x1a0   :  { %v290_v52 = vmax.f32 %v288_v2, %v289_v50 }
 0x1a2   :  { %v291_v53 = vrot.slane %v290_v52, 2 }
 0x1a4   :  { %v292_v55 = vmax.f32 %v290_v52, %v291_v53 }
 0x1a6   :  { %v293_v56 = vrot.slane %v292_v55, 1 }
 0x1a8   :  { %v294_v58 = vmax.f32 %v292_v55, %v293_v56 }
 0x1aa   :  { %v296_v60 = vsel %vm295_vm13, %v285_v57, %v294_v58 }
 0x1ab   :  { %v298_v61 = vsel %vm297_vm14, %v296_v60, 0.0 }
 0x1ac   :  { %v304_v62 = vadd.f32 %v419_v59, %v298_v61 }
 0x1ae   :  { %v305_v63 = vmax.f32 %v304_v62, 0.0 }
 0x1b0   :  { %471 = vmatmul.mubr.f32.vlgmr.msra.gmra.mrb[0].mxu1 %v305_v63 }
 0x283   :  { %v393_v1 = vpop.f32.mrb[0].mxu1 }
 0x284   :  { %v394_v3 = vadd.f32 %v420_v0, %v393_v1  ;;  %v472_v4 = vpop.f32.mrb[1].mxu1 }
 0x286   :  { %397 = vst [vmem:[%s719_s2] sm:$0xff] %v394_v3 }
 0x287   :  { %402 = vsyncpa [#allocation3], 1 }

</bundles_post_ra>
